<compile_context>
chip_gen: v6e
topology: v6e:2x2x1
jax: 0.10.0
libtpu: 0.0.40
codegen_flags: <defaults>
</compile_context>

<pallas_src>
import math

import jax
import jax.numpy as jnp
from jax.experimental import pallas as pl
from jax.experimental.pallas import tpu as pltpu


_ONEHOT_TABLE_CAP_BYTES = 4 * 1024 * 1024    # table kept VMEM-resident below this
_VMEM_BLOCK_BUDGET_BYTES = 8 * 1024 * 1024   # per buffer (x2 for double-buffering)


# -----------------------------------------------------------------------------
# Path 1: VMEM-resident table, one-hot gather on the MXU (small tables / tiny E)
# -----------------------------------------------------------------------------
def _embed_onehot_kernel(ids_ref, table_ref, o_ref):
    """ids_ref: (tb, 1) int32 VMEM; table_ref: (V, E) VMEM; o_ref: (tb, E) VMEM."""
    tb, _ = o_ref.shape
    V = table_ref.shape[0]
    ids = ids_ref[...]                                        # (tb, 1)
    iota = jax.lax.broadcasted_iota(jnp.int32, (tb, V), 1)    # (tb, V)
    onehot = (iota == ids).astype(table_ref.dtype)            # exact 0/1 rows
    o_ref[...] = jnp.dot(
        onehot, table_ref[...], preferred_element_type=jnp.float32
    ).astype(o_ref.dtype)


# -----------------------------------------------------------------------------
# Path 2: table in HBM, per-row DMA gather straight into the output block
# -----------------------------------------------------------------------------
def _embed_dma_kernel(ids_ref, table_hbm, o_ref, sem):
    """ids_ref: (tb,) int32 SMEM block; table_hbm: (V, E) HBM; o_ref: (tb, E) VMEM."""
    tb = o_ref.shape[0]
    V = table_hbm.shape[0]

    # Issue one row-gather DMA per token.  Unrolled so the LLO scheduler can
    # co-issue the scalar id load, address math and descriptor push.
    def issue(t, carry):
        row = ids_ref[t]
        pltpu.make_async_copy(table_hbm.at[row], o_ref.at[t], sem).start()
        return carry

    jax.lax.fori_loop(0, tb, issue, 0, unroll=8)

    # Single drain.  Every row copy moves exactly E*itemsize bytes and signals
    # the same semaphore, so one wait sized tb*E*itemsize drains all of them.
    # The wait descriptor's source only sizes it; use a table slice when the
    # table has >= tb rows (the common case), else the output block itself.
    if V >= tb:  # static (shapes are compile-time)
        wait_src = table_hbm.at[pl.ds(0, tb)]
    else:
        wait_src = o_ref
    pltpu.make_async_copy(wait_src, o_ref, sem).wait()


# -----------------------------------------------------------------------------
# Wrapper: nn.Embedding forward semantics
# -----------------------------------------------------------------------------
def token_embeddings(x, table, *, token_block=256, path=None):
    """x: integer ids of any shape; table: (vocab, embed_dim).

    Returns (*x.shape, embed_dim).  path: None (auto), "onehot", or "dma".
    """
    V, E = table.shape
    lead_shape = x.shape
    N = math.prod(lead_shape) if lead_shape else 1
    itemsize = jnp.dtype(table.dtype).itemsize
    row_bytes = E * itemsize
    table_bytes = V * E * itemsize

    if path is None:
        # Small tables -> VMEM-resident one-hot gather (also covers tiny-E
        # cases where per-row DMAs would be sub-512 B).
        path = "onehot" if table_bytes <= _ONEHOT_TABLE_CAP_BYTES else "dma"

    # Clamp like jnp.take (avoids OOB HBM DMAs / out-of-range one-hot rows).
    ids = jnp.clip(x.reshape(N).astype(jnp.int32), 0, V - 1)

    # Size the token block so double-buffered working set stays within budget.
    if path == "onehot":
        tb = min(token_block, max(8, (_VMEM_BLOCK_BUDGET_BYTES // max(V * 4, 1))))
    else:
        tb = min(token_block, max(8, (_VMEM_BLOCK_BUDGET_BYTES // max(row_bytes, 1))))
    tb = max(8, (tb // 8) * 8)

    n_pad = pl.cdiv(N, tb) * tb
    if n_pad != N:
        ids = jnp.concatenate([ids, jnp.zeros((n_pad - N,), jnp.int32)])

    grid = (n_pad // tb,)
    cparams = pltpu.CompilerParams(
        dimension_semantics=("parallel",),          # megacore-shard tokens (v7x)
        vmem_limit_bytes=32 * 1024 * 1024,
    )

    if path == "onehot":
        out_flat = pl.pallas_call(
            _embed_onehot_kernel,
            out_shape=jax.ShapeDtypeStruct((n_pad, E), table.dtype),
            grid_spec=pltpu.PrefetchScalarGridSpec(
                num_scalar_prefetch=0,
                grid=grid,
                in_specs=[
                    pl.BlockSpec((tb, 1), lambda i: (i, 0)),
                    pl.BlockSpec((V, E), lambda i: (0, 0)),   # whole table, fetched once
                ],
                out_specs=pl.BlockSpec((tb, E), lambda i: (i, 0)),
            ),
            compiler_params=cparams,
        )(ids.reshape(n_pad, 1), table)
    else:
        out_flat = pl.pallas_call(
            _embed_dma_kernel,
            out_shape=jax.ShapeDtypeStruct((n_pad, E), table.dtype),
            grid_spec=pltpu.PrefetchScalarGridSpec(
                num_scalar_prefetch=0,
                grid=grid,
                in_specs=[
                    pl.BlockSpec((tb,), lambda i: (i,),
                                 memory_space=pltpu.MemorySpace.SMEM),
                    pl.BlockSpec(memory_space=pl.ANY),        # table stays in HBM
                ],
                out_specs=pl.BlockSpec((tb, E), lambda i: (i, 0)),
                scratch_shapes=[pltpu.SemaphoreType.DMA(())],
            ),
            compiler_params=cparams,
        )(ids, table)

    return out_flat[:N].reshape(*lead_shape, E)


if __name__ == "__main__":
    # ModelParams-equivalent (small, synthetic) — exercises the one-hot path.
    vocab_size = 64
    embed_dim = 32
    batch, seq = 2, 8

    key = jax.random.PRNGKey(0)
    k_tab, k_ids = jax.random.split(key)

    # nn.Embedding default init: N(0, 1)
    table = jax.random.normal(k_tab, (vocab_size, embed_dim), dtype=jnp.float32)
    x = jax.random.randint(k_ids, (batch, seq), 0, vocab_size, dtype=jnp.int32)

    out = jax.block_until_ready(token_embeddings(x, table))
    ref = jnp.take(table, x.reshape(-1), axis=0).reshape(batch, seq, embed_dim)
    assert out.shape == (batch, seq, embed_dim)
    assert out.dtype == jnp.float32
    assert jnp.allclose(out, ref), "one-hot path mismatch vs reference gather"

    # Also exercise the HBM DMA-gather path on a slightly larger (still small)
    # table by forcing path="dma".
    v2, e2 = 256, 256
    table2 = jax.random.normal(k_tab, (v2, e2), dtype=jnp.float32)
    x2 = jax.random.randint(k_ids, (2, 24), 0, v2, dtype=jnp.int32)
    out2 = jax.block_until_ready(token_embeddings(x2, table2, path="dma"))
    ref2 = jnp.take(table2, x2.reshape(-1), axis=0).reshape(2, 24, e2)
    assert jnp.allclose(out2, ref2), "DMA path mismatch vs reference gather"

    print("KERNEL_OK")
</pallas_src>

<mosaic_0001>
module attributes {stable_mosaic.version = 11 : i64} {
  func.func @_embed_onehot_kernel(%arg0: i32, %arg1: memref<256x1xi32, #tpu.memory_space<vmem>>, %arg2: memref<64x32xf32, #tpu.memory_space<vmem>>, %arg3: memref<256x32xf32, #tpu.memory_space<vmem>>) attributes {dimension_semantics = [#tpu.dimension_semantics<parallel>], iteration_bounds = array<i64: 1>, scalar_prefetch = 0 : i64, scratch_operands = 0 : i64, tpu.core_type = #tpu.core_type<tc>, window_params = [{transform_indices = @transform_0, window_bounds = array<i64: 256, 1>}, {pipeline_mode = #tpu.pipeline_mode<synchronous>, transform_indices = @transform_1, window_bounds = array<i64: 64, 32>}, {transform_indices = @transform_2, window_bounds = array<i64: 256, 32>}]} {
    %c0 = arith.constant 0 : index
    %c0_0 = arith.constant 0 : index
    %0 = vector.load %arg1[%c0, %c0_0] : memref<256x1xi32, #tpu.memory_space<vmem>>, vector<256x1xi32>
    %1 = tpu.iota {dimensions = array<i32: 1>} : vector<256x64xi32>
    %2 = vector.broadcast %0 : vector<256x1xi32> to vector<256x64xi32>
    %3 = arith.cmpi eq, %1, %2 : vector<256x64xi32>
    %4 = arith.extui %3 : vector<256x64xi1> to vector<256x64xi32>
    %5 = arith.sitofp %4 : vector<256x64xi32> to vector<256x64xf32>
    %c0_1 = arith.constant 0 : index
    %c0_2 = arith.constant 0 : index
    %6 = vector.load %arg2[%c0_1, %c0_2] : memref<64x32xf32, #tpu.memory_space<vmem>>, vector<64x32xf32>
    %cst = arith.constant dense<0.000000e+00> : vector<256x32xf32>
    %7 = tpu.matmul %5, %6, %cst {dimension_numbers = #tpu.dot_dimension_numbers<[1], [0], [0], [1], [0, 0, 1, 1], [], []>} : vector<256x64xf32>, vector<64x32xf32>, vector<256x32xf32> -> vector<256x32xf32>
    %c0_3 = arith.constant 0 : index
    %c0_4 = arith.constant 0 : index
    %8 = vector.load %arg3[%c0_3, %c0_4] : memref<256x32xf32, #tpu.memory_space<vmem>>, vector<256x32xf32>
    tpu.vector_store %arg3[%c0_3, %c0_4], %7 {strides = array<i32>} : memref<256x32xf32, #tpu.memory_space<vmem>>, vector<256x32xf32>,
    return
  }
  func.func @transform_0(%arg0: i32) -> (i32, i32) {
    %c0_i32 = arith.constant 0 : i32
    %c0_i32_0 = arith.constant 0 : i32
    return %arg0, %c0_i32 : i32, i32
  }
  func.func @transform_1(%arg0: i32) -> (i32, i32) {
    %c0_i32 = arith.constant 0 : i32
    %c0_i32_0 = arith.constant 0 : i32
    %c0_i32_1 = arith.constant 0 : i32
    return %c0_i32, %c0_i32_0 : i32, i32
  }
  func.func @transform_2(%arg0: i32) -> (i32, i32) {
    %c0_i32 = arith.constant 0 : i32
    %c0_i32_0 = arith.constant 0 : i32
    return %arg0, %c0_i32 : i32, i32
  }
}

</mosaic_0001>

<bundles_post_ra>
// kernel: tpu_custom_call.1
= control target key start
LH: loop header
LB: loop body
LE: loop exit
PB: predicated region body
PF: predicated region fallthrough
CT: control target
= control target key end

     0   :  { %v792_v0 = vmov 0   ;;  %v43_v41 = vlaneseq  ;;  %vm245_vm0 = vcmask 523264   ;;  %v793_v45 = vmov 0.0   ;;  %s1155_s0 = inlined_call_operand.vmem [shape: s32[256,1], index: 0, kind: input, shape index: {}]   ;;  %s1156_s1 = inlined_call_operand.vmem [shape: f32[64,32], index: 1, kind: input, shape index: {}]   ;;  %s1157_s2 = inlined_call_operand.vmem [shape: f32[256,32], index: 2, kind: output, shape index: {}]  }
   0x1   :  { %791 = vset.pattern.permute.xlu1 %v792_v0  ;;  %790 = vset.pattern.permute.xlu0 %v792_v0  ;;  %v12_v1 = vld [vmem:[%s1155_s0 + $0x8] sm:$0xff]  ;;  %v11_v2 = vld [vmem:[%s1155_s0] sm:$0xff]  ;;  %v29_v5 = vld [vmem:[%s1155_s0 + $0x90] sm:$0xff] }
   0x2   :  { %49 = vperm.xlu1 %791, %v12_v1   ;;  %46 = vperm.xlu0 %790, %v11_v2   ;;  %v28_v3 = vld [vmem:[%s1155_s0 + $0x88] sm:$0xff]  ;;  %v27_v4 = vld [vmem:[%s1155_s0 + $0x80] sm:$0xff]  ;;  %v13_v6 = vld [vmem:[%s1155_s0 + $0x10] sm:$0xff]  ;;  %v929_v42 = vand.u32 127, %v43_v41 }
   0x3   :  { %v30_v7 = vld [vmem:[%s1155_s0 + $0x98] sm:$0xff]  ;;  %v243_v10 = vld [vmem:[%s1156_s1 + $0x30] sm:$0xff]  ;;  %v242_v11 = vld [vmem:[%s1156_s1 + $0x28] sm:$0xff] }
   0x4   :  { %v14_v8 = vld [vmem:[%s1155_s0 + $0x18] sm:$0xff]  ;;  %v31_v12 = vld [vmem:[%s1155_s0 + $0xa0] sm:$0xff]  ;;  %v32_v15 = vld [vmem:[%s1155_s0 + $0xa8] sm:$0xff] }
   0x5   :  { %v244_v9 = vld [vmem:[%s1156_s1 + $0x38] sm:$0xff]  ;;  %v15_v13 = vld [vmem:[%s1155_s0 + $0x20] sm:$0xff]  ;;  %v16_v16 = vld [vmem:[%s1155_s0 + $0x28] sm:$0xff] }
   0x6   :  { %97 = vperm.xlu1 %791, %v28_v3   ;;  %94 = vperm.xlu0 %790, %v27_v4   ;;  %v241_v14 = vld [vmem:[%s1156_s1 + $0x20] sm:$0xff]  ;;  %v240_v17 = vld [vmem:[%s1156_s1 + $0x18] sm:$0xff]  ;;  %v239_v18 = vld [vmem:[%s1156_s1 + $0x10] sm:$0xff] }
   0x7   :  { %708 = vmatprep.subr.mxu0 %v244_v9  ;;  %772 = vmatprep.subr.mxu1 %v244_v9  ;;  %v33_v19 = vld [vmem:[%s1155_s0 + $0xb0] sm:$0xff]  ;;  %v238_v21 = vld [vmem:[%s1156_s1 + $0x8] sm:$0xff]  ;;  %v34_v22 = vld [vmem:[%s1155_s0 + $0xb8] sm:$0xff] }
   0x8   :  { %709 = vmatpush3.msra.mxu0 %v244_v9  ;;  %780 = vmatpush3.msra.mxu1 %v244_v9  ;;  %v17_v20 = vld [vmem:[%s1155_s0 + $0x30] sm:$0xff]  ;;  %v18_v23 = vld [vmem:[%s1155_s0 + $0x38] sm:$0xff]  ;;  %v237_v24 = vld [vmem:[%s1156_s1] sm:$0xff] }
   0x9   :  { %710 = vmatprep.subr.mxu0 %v243_v10  ;;  %773 = vmatprep.subr.mxu1 %v243_v10  ;;  %v35_v25 = vld [vmem:[%s1155_s0 + $0xc0] sm:$0xff]  ;;  %v36_v27 = vld [vmem:[%s1155_s0 + $0xc8] sm:$0xff]  ;;  %v37_v29 = vld [vmem:[%s1155_s0 + $0xd0] sm:$0xff] }
   0xa   :  { %100 = vperm.xlu1 %791, %v29_v5   ;;  %52 = vperm.xlu0 %790, %v13_v6   ;;  %v19_v26 = vld [vmem:[%s1155_s0 + $0x40] sm:$0xff]  ;;  %v20_v28 = vld [vmem:[%s1155_s0 + $0x48] sm:$0xff]  ;;  %v21_v30 = vld [vmem:[%s1155_s0 + $0x50] sm:$0xff] }
   0xb   :  { %711 = vmatpush3.msra.mxu0 %v243_v10  ;;  %781 = vmatpush3.msra.mxu1 %v243_v10  ;;  %v38_v31 = vld [vmem:[%s1155_s0 + $0xd8] sm:$0xff]  ;;  %v39_v33 = vld [vmem:[%s1155_s0 + $0xe0] sm:$0xff]  ;;  %v40_v35 = vld [vmem:[%s1155_s0 + $0xe8] sm:$0xff] }
   0xc   :  { %712 = vmatprep.subr.mxu0 %v242_v11  ;;  %774 = vmatprep.subr.mxu1 %v242_v11  ;;  %v22_v32 = vld [vmem:[%s1155_s0 + $0x58] sm:$0xff]  ;;  %v23_v34 = vld [vmem:[%s1155_s0 + $0x60] sm:$0xff]  ;;  %v24_v36 = vld [vmem:[%s1155_s0 + $0x68] sm:$0xff] }
   0xd   :  { %713 = vmatpush3.msra.mxu0 %v242_v11  ;;  %782 = vmatpush3.msra.mxu1 %v242_v11  ;;  %v41_v37 = vld [vmem:[%s1155_s0 + $0xf0] sm:$0xff]  ;;  %v42_v39 = vld [vmem:[%s1155_s0 + $0xf8] sm:$0xff] }
   0xe   :  { %103 = vperm.xlu1 %791, %v30_v7   ;;  %55 = vperm.xlu0 %790, %v14_v8   ;;  %v25_v38 = vld [vmem:[%s1155_s0 + $0x70] sm:$0xff]  ;;  %v26_v40 = vld [vmem:[%s1155_s0 + $0x78] sm:$0xff] }
   0xf   :  { %714 = vmatprep.subr.mxu0 %v241_v14  ;;  %775 = vmatprep.subr.mxu1 %v241_v14 }
  0x10   :  { %715 = vmatpush3.msra.mxu0 %v241_v14  ;;  %783 = vmatpush3.msra.mxu1 %v241_v14 }
  0x11   :  { %716 = vmatprep.subr.mxu0 %v240_v17  ;;  %776 = vmatprep.subr.mxu1 %v240_v17 }
  0x12   :  { %106 = vperm.xlu1 %791, %v31_v12   ;;  %58 = vperm.xlu0 %790, %v15_v13  }
  0x13   :  { %717 = vmatpush3.msra.mxu0 %v240_v17  ;;  %784 = vmatpush3.msra.mxu1 %v240_v17 }
  0x14   :  { %718 = vmatprep.subr.mxu0 %v239_v18  ;;  %777 = vmatprep.subr.mxu1 %v239_v18 }
  0x15   :  { %719 = vmatpush3.msra.mxu0 %v239_v18  ;;  %785 = vmatpush3.msra.mxu1 %v239_v18 }
  0x16   :  { %109 = vperm.xlu1 %791, %v32_v15   ;;  %61 = vperm.xlu0 %790, %v16_v16  }
  0x17   :  { %720 = vmatprep.subr.mxu0 %v238_v21  ;;  %778 = vmatprep.subr.mxu1 %v238_v21 }
  0x18   :  { %721 = vmatpush3.msra.mxu0 %v238_v21  ;;  %786 = vmatpush3.msra.mxu1 %v238_v21 }
  0x19   :  { %722 = vmatprep.subr.mxu0 %v237_v24  ;;  %779 = vmatprep.subr.mxu1 %v237_v24 }
  0x1a   :  { %112 = vperm.xlu1 %791, %v33_v19   ;;  %64 = vperm.xlu0 %790, %v17_v20  }
  0x1b   :  { %723 = vmatpush3.msra.mxu0 %v237_v24  ;;  %787 = vmatpush3.msra.mxu1 %v237_v24 }
  0x1e   :  { %115 = vperm.xlu1 %791, %v34_v22   ;;  %67 = vperm.xlu0 %790, %v18_v23  }
  0x22   :  { %118 = vperm.xlu1 %791, %v35_v25   ;;  %70 = vperm.xlu0 %790, %v19_v26  }
  0x26   :  { %121 = vperm.xlu1 %791, %v36_v27   ;;  %73 = vperm.xlu0 %790, %v20_v28  }
  0x2a   :  { %124 = vperm.xlu1 %791, %v37_v29   ;;  %76 = vperm.xlu0 %790, %v21_v30  }
  0x2e   :  { %127 = vperm.xlu1 %791, %v38_v31   ;;  %79 = vperm.xlu0 %790, %v22_v32  }
  0x32   :  { %130 = vperm.xlu1 %791, %v39_v33   ;;  %82 = vperm.xlu0 %790, %v23_v34  }
  0x36   :  { %133 = vperm.xlu1 %791, %v40_v35   ;;  %85 = vperm.xlu0 %790, %v24_v36  }
  0x3a   :  { %136 = vperm.xlu1 %791, %v41_v37   ;;  %88 = vperm.xlu0 %790, %v25_v38  }
  0x3e   :  { %139 = vperm.xlu1 %791, %v42_v39   ;;  %91 = vperm.xlu0 %790, %v26_v40  }
  0x7d   :  { %v50_v43 = vpop.permute.xlu1 %49  ;;  %v47_v44 = vpop.permute.xlu0 %46 }
  0x7e   :  { %vm142_vm1 = vcmp.eq.s32.totalorder %v929_v42, %v50_v43  ;;  %vm141_vm2 = vcmp.eq.s32.totalorder %v929_v42, %v47_v44 }
  0x7f   :  { %v605_v46 = vsel %vm142_vm1, 1.0, %v793_v45  ;;  %v604_v47 = vsel %vm141_vm2, 1.0, %v793_v45 }
  0x80   :  { %724 = vmatprep.mubr.msk.f32.mxu0 %vm245_vm0, %v604_v47 }
  0x81   :  { %v98_v48 = vpop.permute.xlu1 %97  ;;  %725 = vmatmul.mubr.msk.f32.vlgmr.msra.gmra.mxu0 %vm245_vm0, %v605_v46  ;;  %v95_v49 = vpop.permute.xlu0 %94 }
  0x82   :  { %vm158_vm3 = vcmp.eq.s32.totalorder %v929_v42, %v98_v48  ;;  %vm157_vm4 = vcmp.eq.s32.totalorder %v929_v42, %v95_v49 }
  0x83   :  { %v621_v50 = vsel %vm158_vm3, 1.0, %v793_v45  ;;  %v620_v51 = vsel %vm157_vm4, 1.0, %v793_v45 }
  0x84   :  { %748 = vmatprep.mubr.msk.f32.mxu1 %vm245_vm0, %v620_v51 }
  0x85   :  { %v101_v52 = vpop.permute.xlu1 %100  ;;  %749 = vmatmul.mubr.msk.f32.vlgmr.msra.gmra.mxu1 %vm245_vm0, %v621_v50  ;;  %v53_v53 = vpop.permute.xlu0 %52 }
  0x86   :  { %vm159_vm5 = vcmp.eq.s32.totalorder %v929_v42, %v101_v52  ;;  %vm143_vm6 = vcmp.eq.s32.totalorder %v929_v42, %v53_v53 }
  0x87   :  { %v622_v54 = vsel %vm159_vm5, 1.0, %v793_v45  ;;  %v606_v55 = vsel %vm143_vm6, 1.0, %v793_v45 }
  0x88   :  { %727 = vmatprep.mubr.msk.f32.mxu0 %vm245_vm0, %v606_v55  ;;  %751 = vmatprep.mubr.msk.f32.mxu1 %vm245_vm0, %v622_v54 }
  0x89   :  { %v104_v56 = vpop.permute.xlu1 %103  ;;  %v56_v57 = vpop.permute.xlu0 %55 }
  0x8a   :  { %vm160_vm7 = vcmp.eq.s32.totalorder %v929_v42, %v104_v56  ;;  %vm144_vm8 = vcmp.eq.s32.totalorder %v929_v42, %v56_v57 }
  0x8b   :  { %v623_v58 = vsel %vm160_vm7, 1.0, %v793_v45  ;;  %v607_v59 = vsel %vm144_vm8, 1.0, %v793_v45 }
  0x8c   :  { %728 = vmatmul.mubr.msk.f32.gmra.mxu0 %vm245_vm0, %v607_v59  ;;  %752 = vmatmul.mubr.msk.f32.gmra.mxu1 %vm245_vm0, %v623_v58 }
  0x8d   :  { %v107_v60 = vpop.permute.xlu1 %106  ;;  %v59_v61 = vpop.permute.xlu0 %58 }
  0x8e   :  { %vm161_vm9 = vcmp.eq.s32.totalorder %v929_v42, %v107_v60  ;;  %vm145_vm10 = vcmp.eq.s32.totalorder %v929_v42, %v59_v61 }
  0x8f   :  { %v624_v62 = vsel %vm161_vm9, 1.0, %v793_v45  ;;  %v608_v63 = vsel %vm145_vm10, 1.0, %v793_v45 }
  0x90   :  { %730 = vmatprep.mubr.msk.f32.mxu0 %vm245_vm0, %v608_v63  ;;  %754 = vmatprep.mubr.msk.f32.mxu1 %vm245_vm0, %v624_v62 }
  0x91   :  { %v110_v0 = vpop.permute.xlu1 %109  ;;  %v62_v1 = vpop.permute.xlu0 %61 }
  0x92   :  { %vm162_vm11 = vcmp.eq.s32.totalorder %v929_v42, %v110_v0  ;;  %vm146_vm12 = vcmp.eq.s32.totalorder %v929_v42, %v62_v1 }
  0x93   :  { %v625_v2 = vsel %vm162_vm11, 1.0, %v793_v45  ;;  %v609_v3 = vsel %vm146_vm12, 1.0, %v793_v45 }
  0x94   :  { %731 = vmatmul.mubr.msk.f32.gmra.mxu0 %vm245_vm0, %v609_v3  ;;  %755 = vmatmul.mubr.msk.f32.gmra.mxu1 %vm245_vm0, %v625_v2 }
  0x95   :  { %v113_v4 = vpop.permute.xlu1 %112  ;;  %v65_v5 = vpop.permute.xlu0 %64 }
  0x96   :  { %vm163_vm13 = vcmp.eq.s32.totalorder %v929_v42, %v113_v4  ;;  %vm147_vm14 = vcmp.eq.s32.totalorder %v929_v42, %v65_v5 }
  0x97   :  { %v626_v6 = vsel %vm163_vm13, 1.0, %v793_v45  ;;  %v610_v7 = vsel %vm147_vm14, 1.0, %v793_v45 }
  0x98   :  { %733 = vmatprep.mubr.msk.f32.mxu0 %vm245_vm0, %v610_v7  ;;  %757 = vmatprep.mubr.msk.f32.mxu1 %vm245_vm0, %v626_v6 }
  0x99   :  { %v116_v8 = vpop.permute.xlu1 %115  ;;  %v68_v9 = vpop.permute.xlu0 %67 }
  0x9a   :  { %vm164_vm15 = vcmp.eq.s32.totalorder %v929_v42, %v116_v8  ;;  %vm148_vm1 = vcmp.eq.s32.totalorder %v929_v42, %v68_v9 }
  0x9b   :  { %v627_v10 = vsel %vm164_vm15, 1.0, %v793_v45  ;;  %v611_v11 = vsel %vm148_vm1, 1.0, %v793_v45 }
  0x9c   :  { %734 = vmatmul.mubr.msk.f32.gmra.mxu0 %vm245_vm0, %v611_v11  ;;  %758 = vmatmul.mubr.msk.f32.gmra.mxu1 %vm245_vm0, %v627_v10 }
  0x9d   :  { %v119_v12 = vpop.permute.xlu1 %118  ;;  %v71_v13 = vpop.permute.xlu0 %70 }
  0x9e   :  { %vm165_vm2 = vcmp.eq.s32.totalorder %v929_v42, %v119_v12  ;;  %vm149_vm3 = vcmp.eq.s32.totalorder %v929_v42, %v71_v13 }
  0x9f   :  { %v628_v14 = vsel %vm165_vm2, 1.0, %v793_v45  ;;  %v612_v15 = vsel %vm149_vm3, 1.0, %v793_v45  ;;  %vm567_vm3 = vcmask 261120  }
  0xa0   :  { %736 = vmatprep.mubr.msk.f32.mxu0 %vm245_vm0, %v612_v15  ;;  %760 = vmatprep.mubr.msk.f32.mxu1 %vm245_vm0, %v628_v14 }
  0xa1   :  { %v122_v16 = vpop.permute.xlu1 %121  ;;  %v74_v17 = vpop.permute.xlu0 %73 }
  0xa2   :  { %vm166_vm4 = vcmp.eq.s32.totalorder %v929_v42, %v122_v16  ;;  %vm150_vm5 = vcmp.eq.s32.totalorder %v929_v42, %v74_v17 }
  0xa3   :  { %v629_v18 = vsel %vm166_vm4, 1.0, %v793_v45  ;;  %v613_v19 = vsel %vm150_vm5, 1.0, %v793_v45 }
  0xa4   :  { %737 = vmatmul.mubr.msk.f32.gmra.mxu0 %vm245_vm0, %v613_v19  ;;  %761 = vmatmul.mubr.msk.f32.gmra.mxu1 %vm245_vm0, %v629_v18 }
  0xa5   :  { %v125_v20 = vpop.permute.xlu1 %124  ;;  %v77_v21 = vpop.permute.xlu0 %76 }
  0xa6   :  { %vm167_vm6 = vcmp.eq.s32.totalorder %v929_v42, %v125_v20  ;;  %vm151_vm7 = vcmp.eq.s32.totalorder %v929_v42, %v77_v21 }
  0xa7   :  { %v630_v22 = vsel %vm167_vm6, 1.0, %v793_v45  ;;  %v614_v23 = vsel %vm151_vm7, 1.0, %v793_v45 }
  0xa8   :  { %739 = vmatprep.mubr.msk.f32.mxu0 %vm245_vm0, %v614_v23  ;;  %763 = vmatprep.mubr.msk.f32.mxu1 %vm245_vm0, %v630_v22 }
  0xa9   :  { %v128_v24 = vpop.permute.xlu1 %127  ;;  %v80_v25 = vpop.permute.xlu0 %79 }
  0xaa   :  { %vm168_vm8 = vcmp.eq.s32.totalorder %v929_v42, %v128_v24  ;;  %vm152_vm9 = vcmp.eq.s32.totalorder %v929_v42, %v80_v25 }
  0xab   :  { %v631_v26 = vsel %vm168_vm8, 1.0, %v793_v45  ;;  %v615_v27 = vsel %vm152_vm9, 1.0, %v793_v45 }
  0xac   :  { %740 = vmatmul.mubr.msk.f32.gmra.mxu0 %vm245_vm0, %v615_v27  ;;  %764 = vmatmul.mubr.msk.f32.gmra.mxu1 %vm245_vm0, %v631_v26 }
  0xad   :  { %v131_v28 = vpop.permute.xlu1 %130  ;;  %v83_v29 = vpop.permute.xlu0 %82 }
  0xae   :  { %vm169_vm10 = vcmp.eq.s32.totalorder %v929_v42, %v131_v28  ;;  %vm153_vm11 = vcmp.eq.s32.totalorder %v929_v42, %v83_v29 }
  0xaf   :  { %v632_v30 = vsel %vm169_vm10, 1.0, %v793_v45  ;;  %v616_v31 = vsel %vm153_vm11, 1.0, %v793_v45 }
  0xb0   :  { %742 = vmatprep.mubr.msk.f32.mxu0 %vm245_vm0, %v616_v31  ;;  %766 = vmatprep.mubr.msk.f32.mxu1 %vm245_vm0, %v632_v30 }
  0xb1   :  { %v134_v32 = vpop.permute.xlu1 %133  ;;  %v86_v33 = vpop.permute.xlu0 %85 }
  0xb2   :  { %vm170_vm12 = vcmp.eq.s32.totalorder %v929_v42, %v134_v32  ;;  %vm154_vm13 = vcmp.eq.s32.totalorder %v929_v42, %v86_v33 }
  0xb3   :  { %v633_v34 = vsel %vm170_vm12, 1.0, %v793_v45  ;;  %v617_v35 = vsel %vm154_vm13, 1.0, %v793_v45 }
  0xb4   :  { %743 = vmatmul.mubr.msk.f32.gmra.mxu0 %vm245_vm0, %v617_v35  ;;  %767 = vmatmul.mubr.msk.f32.gmra.mxu1 %vm245_vm0, %v633_v34 }
  0xb5   :  { %v137_v36 = vpop.permute.xlu1 %136  ;;  %v89_v37 = vpop.permute.xlu0 %88 }
  0xb6   :  { %vm171_vm14 = vcmp.eq.s32.totalorder %v929_v42, %v137_v36  ;;  %vm155_vm15 = vcmp.eq.s32.totalorder %v929_v42, %v89_v37 }
  0xb7   :  { %v634_v38 = vsel %vm171_vm14, 1.0, %v793_v45  ;;  %v618_v39 = vsel %vm155_vm15, 1.0, %v793_v45 }
  0xb8   :  { %745 = vmatprep.mubr.msk.f32.mxu0 %vm245_vm0, %v618_v39  ;;  %769 = vmatprep.mubr.msk.f32.mxu1 %vm245_vm0, %v634_v38 }
  0xb9   :  { %v140_v40 = vpop.permute.xlu1 %139  ;;  %v92_v41 = vpop.permute.xlu0 %91 }
  0xba   :  { %vm172_vm1 = vcmp.eq.s32.totalorder %v929_v42, %v140_v40  ;;  %vm156_vm2 = vcmp.eq.s32.totalorder %v929_v42, %v92_v41 }
  0xbb   :  { %v635_v43 = vsel %vm172_vm1, 1.0, %v793_v45  ;;  %v619_v44 = vsel %vm156_vm2, 1.0, %v793_v45 }
  0xbc   :  { %746 = vmatmul.mubr.msk.f32.gmra.mxu0 %vm245_vm0, %v619_v44  ;;  %770 = vmatmul.mubr.msk.f32.gmra.mxu1 %vm245_vm0, %v635_v43 }
 0x141   :  { %v726_v46 = vpop.f32.mrf.mxu0 }
 0x142   :  { %569 = vst.msk [vmem:[%s1157_s2 + $0x8] sm:$0xff] %vm567_vm3, %v726_v46 }
 0x143   :  { %v408_v47 = vpop.f32.mrf.mxu0 }
 0x144   :  { %568 = vst.msk [vmem:[%s1157_s2] sm:$0xff] %vm567_vm3, %v408_v47 }
 0x145   :  { %v750_v42 = vpop.f32.mrf.mxu1 }
 0x146   :  { %585 = vst.msk [vmem:[%s1157_s2 + $0x88] sm:$0xff] %vm567_vm3, %v750_v42 }
 0x147   :  { %v488_v45 = vpop.f32.mrf.mxu1 }
 0x148   :  { %584 = vst.msk [vmem:[%s1157_s2 + $0x80] sm:$0xff] %vm567_vm3, %v488_v45 }
 0x14c   :  { %v729_v48 = vpop.f32.mrf.mxu0  ;;  %v753_v49 = vpop.f32.mrf.mxu1 }
 0x14d   :  { %571 = vst.msk [vmem:[%s1157_s2 + $0x18] sm:$0xff] %vm567_vm3, %v729_v48  ;;  %587 = vst.msk [vmem:[%s1157_s2 + $0x98] sm:$0xff] %vm567_vm3, %v753_v49 }
 0x14e   :  { %v418_v50 = vpop.f32.mrf.mxu0  ;;  %v498_v51 = vpop.f32.mrf.mxu1 }
 0x14f   :  { %570 = vst.msk [vmem:[%s1157_s2 + $0x10] sm:$0xff] %vm567_vm3, %v418_v50  ;;  %586 = vst.msk [vmem:[%s1157_s2 + $0x90] sm:$0xff] %vm567_vm3, %v498_v51 }
 0x154   :  { %v732_v52 = vpop.f32.mrf.mxu0  ;;  %v756_v53 = vpop.f32.mrf.mxu1 }
 0x155   :  { %573 = vst.msk [vmem:[%s1157_s2 + $0x28] sm:$0xff] %vm567_vm3, %v732_v52  ;;  %589 = vst.msk [vmem:[%s1157_s2 + $0xa8] sm:$0xff] %vm567_vm3, %v756_v53 }
 0x156   :  { %v428_v54 = vpop.f32.mrf.mxu0  ;;  %v508_v55 = vpop.f32.mrf.mxu1 }
 0x157   :  { %572 = vst.msk [vmem:[%s1157_s2 + $0x20] sm:$0xff] %vm567_vm3, %v428_v54  ;;  %588 = vst.msk [vmem:[%s1157_s2 + $0xa0] sm:$0xff] %vm567_vm3, %v508_v55 }
 0x15c   :  { %v735_v56 = vpop.f32.mrf.mxu0  ;;  %v759_v57 = vpop.f32.mrf.mxu1 }
 0x15d   :  { %575 = vst.msk [vmem:[%s1157_s2 + $0x38] sm:$0xff] %vm567_vm3, %v735_v56  ;;  %591 = vst.msk [vmem:[%s1157_s2 + $0xb8] sm:$0xff] %vm567_vm3, %v759_v57 }
 0x15e   :  { %v438_v58 = vpop.f32.mrf.mxu0  ;;  %v518_v59 = vpop.f32.mrf.mxu1 }
 0x15f   :  { %574 = vst.msk [vmem:[%s1157_s2 + $0x30] sm:$0xff] %vm567_vm3, %v438_v58  ;;  %590 = vst.msk [vmem:[%s1157_s2 + $0xb0] sm:$0xff] %vm567_vm3, %v518_v59 }
 0x164   :  { %v738_v60 = vpop.f32.mrf.mxu0  ;;  %v762_v61 = vpop.f32.mrf.mxu1 }
 0x165   :  { %577 = vst.msk [vmem:[%s1157_s2 + $0x48] sm:$0xff] %vm567_vm3, %v738_v60  ;;  %593 = vst.msk [vmem:[%s1157_s2 + $0xc8] sm:$0xff] %vm567_vm3, %v762_v61 }
 0x166   :  { %v448_v62 = vpop.f32.mrf.mxu0  ;;  %v528_v63 = vpop.f32.mrf.mxu1 }
 0x167   :  { %576 = vst.msk [vmem:[%s1157_s2 + $0x40] sm:$0xff] %vm567_vm3, %v448_v62  ;;  %592 = vst.msk [vmem:[%s1157_s2 + $0xc0] sm:$0xff] %vm567_vm3, %v528_v63 }
 0x16c   :  { %v741_v0 = vpop.f32.mrf.mxu0  ;;  %v765_v1 = vpop.f32.mrf.mxu1 }
 0x16d   :  { %579 = vst.msk [vmem:[%s1157_s2 + $0x58] sm:$0xff] %vm567_vm3, %v741_v0  ;;  %595 = vst.msk [vmem:[%s1157_s2 + $0xd8] sm:$0xff] %vm567_vm3, %v765_v1 }
 0x16e   :  { %v458_v2 = vpop.f32.mrf.mxu0  ;;  %v538_v3 = vpop.f32.mrf.mxu1 }
 0x16f   :  { %578 = vst.msk [vmem:[%s1157_s2 + $0x50] sm:$0xff] %vm567_vm3, %v458_v2  ;;  %594 = vst.msk [vmem:[%s1157_s2 + $0xd0] sm:$0xff] %vm567_vm3, %v538_v3 }
 0x174   :  { %v744_v4 = vpop.f32.mrf.mxu0  ;;  %v768_v5 = vpop.f32.mrf.mxu1 }
 0x175   :  { %581 = vst.msk [vmem:[%s1157_s2 + $0x68] sm:$0xff] %vm567_vm3, %v744_v4  ;;  %597 = vst.msk [vmem:[%s1157_s2 + $0xe8] sm:$0xff] %vm567_vm3, %v768_v5 }
 0x176   :  { %v468_v6 = vpop.f32.mrf.mxu0  ;;  %v548_v7 = vpop.f32.mrf.mxu1 }
 0x177   :  { %580 = vst.msk [vmem:[%s1157_s2 + $0x60] sm:$0xff] %vm567_vm3, %v468_v6  ;;  %596 = vst.msk [vmem:[%s1157_s2 + $0xe0] sm:$0xff] %vm567_vm3, %v548_v7 }
 0x17c   :  { %v747_v8 = vpop.f32.mrf.mxu0  ;;  %v771_v9 = vpop.f32.mrf.mxu1 }
 0x17d   :  { %583 = vst.msk [vmem:[%s1157_s2 + $0x78] sm:$0xff] %vm567_vm3, %v747_v8  ;;  %599 = vst.msk [vmem:[%s1157_s2 + $0xf8] sm:$0xff] %vm567_vm3, %v771_v9 }
 0x17e   :  { %v478_v10 = vpop.f32.mrf.mxu0  ;;  %v558_v11 = vpop.f32.mrf.mxu1 }
 0x17f   :  { %582 = vst.msk [vmem:[%s1157_s2 + $0x70] sm:$0xff] %vm567_vm3, %v478_v10  ;;  %598 = vst.msk [vmem:[%s1157_s2 + $0xf0] sm:$0xff] %vm567_vm3, %v558_v11 }

</bundles_post_ra>
